<compile_context>
chip_gen: v6e
topology: v6e:2x2x1
jax: 0.10.0
libtpu: 0.0.40
codegen_flags: <defaults>
</compile_context>

<pallas_src>
import jax
import jax.numpy as jnp
from jax import lax
from jax.experimental import pallas as pl
from jax.experimental.pallas import tpu as pltpu


def nlblock_kernel(xq_ref, xf_ref, wt_ref, bt_ref, wp_ref, bp_ref, o_ref):
    # xq_ref: (1, C_in, TQ)    channels-major query tile of x
    # xf_ref: (1, C_in, HW)    channels-major full x row (keys)
    # wt_ref: (C_inter, C_in)  theta 1x1-conv weight
    # bt_ref: (C_inter, 1)     theta bias
    # wp_ref: (C_inter, C_in)  phi 1x1-conv weight
    # bp_ref: (C_inter, 1)     phi bias
    # o_ref:  (1, TQ, HW)      softmax rows for this query tile
    xq = xq_ref[0]                                   # (C_in, TQ)  lane-dense
    xf = xf_ref[0]                                   # (C_in, HW)  lane-dense

    # 1x1 conv == channels matmul: (C_inter, C_in) @ (C_in, X) -> (C_inter, X)
    theta = jnp.dot(wt_ref[...], xq, preferred_element_type=jnp.float32) + bt_ref[...]
    phi = jnp.dot(wp_ref[...], xf, preferred_element_type=jnp.float32) + bp_ref[...]

    # f[i, j] = <theta[:, i], phi[:, j]>  -> (TQ, HW); contract C_inter (dim 0)
    # of both operands directly on the MXU (no phi.T relayout).
    f = lax.dot_general(
        theta, phi,
        dimension_numbers=(((0,), (0,)), ((), ())),
        preferred_element_type=jnp.float32,
    )

    # Row-wise, max-stabilized softmax over the full key axis.
    m = jnp.max(f, axis=-1, keepdims=True)           # XLU row reduce
    e = jnp.exp(f - m)                               # EUP
    s = jnp.sum(e, axis=-1, keepdims=True)           # XLU row reduce
    inv = pl.reciprocal(s, approx=True)              # EUP slot, (TQ, 1) only
    inv = inv * (2.0 - s * inv)                      # one Newton step -> f32-exact
    o_ref[0] = (e * inv).astype(o_ref.dtype)


def _pick_query_tile(hw, requested=None):
    """Query-tile size: multiple of 128 that divides HW (or HW itself)."""
    if requested is not None:
        if requested == hw or (requested % 128 == 0 and hw % requested == 0):
            return requested
        return hw
    if hw % 128 != 0:
        return hw
    # Target ~2 MiB f32 output block: double-buffered input/output plus the
    # in-kernel f/e intermediates stay well under scoped-VMEM defaults on
    # v5e (16 MiB) / v6e (32 MiB) / v7x (32 of 64 MiB), while remaining big
    # enough to amortize the ~0.35 us per-grid-step overhead.
    max_rows = max(128, (2 << 20) // (hw * 4))
    tq = 128
    while tq * 2 <= max_rows and hw % (tq * 2) == 0:
        tq *= 2
    return tq


def nlblock_forward(x_nchw, w_theta, b_theta, w_phi, b_phi, *, tq=None):
    """x_nchw: (B, C_in, H, W); w_*: (C_inter, C_in) (nn.Conv2d 1x1); b_*: (C_inter,)."""
    B, C_in, H, W = x_nchw.shape
    C_inter = w_theta.shape[0]
    HW = H * W
    TQ = _pick_query_tile(HW, tq)
    num_q = HW // TQ

    # Channels-major layout: pure reshape, no host-side transpose of x.
    x_flat = x_nchw.reshape(B, C_in, HW).astype(jnp.float32)
    wt = w_theta.astype(jnp.float32)                         # (C_inter, C_in)
    wp = w_phi.astype(jnp.float32)
    bt = b_theta.reshape(C_inter, 1).astype(jnp.float32)
    bp = b_phi.reshape(C_inter, 1).astype(jnp.float32)

    grid_spec = pltpu.PrefetchScalarGridSpec(
        num_scalar_prefetch=0,
        grid=(B, num_q),
        in_specs=[
            pl.BlockSpec((1, C_in, TQ), lambda b, q: (b, 0, q)),   # x queries (theta)
            pl.BlockSpec((1, C_in, HW), lambda b, q: (b, 0, 0)),   # x keys (phi); re-DMA'd only when b changes
            pl.BlockSpec((C_inter, C_in), lambda b, q: (0, 0)),    # theta weight
            pl.BlockSpec((C_inter, 1), lambda b, q: (0, 0)),       # theta bias
            pl.BlockSpec((C_inter, C_in), lambda b, q: (0, 0)),    # phi weight
            pl.BlockSpec((C_inter, 1), lambda b, q: (0, 0)),       # phi bias
        ],
        # Lane-dense output block (last dim = full HW => unmasked vst).
        out_specs=pl.BlockSpec((1, TQ, HW), lambda b, q: (b, q, 0)),
    )

    # Conservative VMEM budget: double-buffered in/out blocks + in-kernel
    # f / e intermediates; raise the scoped limit only as far as needed and
    # never past 64 MiB (v7x physical per-TC VMEM).
    block_bytes = 4 * (2 * TQ * HW            # output block, double-buffered
                       + 2 * C_in * HW        # keys block, double-buffered
                       + 2 * C_in * TQ        # query block, double-buffered
                       + 2 * TQ * HW          # f and e intermediates
                       + 2 * C_inter * (TQ + HW)
                       + 4 * C_inter * (C_in + 1))
    vmem_limit = min(64 << 20, max(32 << 20, int(block_bytes * 1.5)))

    cost = pl.CostEstimate(
        flops=2 * B * HW * HW * C_inter + 4 * B * HW * C_in * C_inter,
        transcendentals=B * HW * HW,
        bytes_accessed=4 * (B * HW * HW                      # output (dominant)
                            + B * C_in * HW * 2              # x (keys once/batch + query tiles)
                            + 2 * C_inter * (C_in + 1)),     # weights + biases
    )

    return pl.pallas_call(
        nlblock_kernel,
        out_shape=jax.ShapeDtypeStruct((B, HW, HW), jnp.float32),
        grid_spec=grid_spec,
        compiler_params=pltpu.CompilerParams(
            dimension_semantics=("parallel", "parallel"),
            vmem_limit_bytes=vmem_limit,
        ),
        cost_estimate=cost,
    )(x_flat, x_flat, wt, bt, wp, bp)


def nlblock_reference(x_nchw, w_theta, b_theta, w_phi, b_phi):
    """Plain-JAX reference replicating the PyTorch forward exactly."""
    B, C_in, H, W = x_nchw.shape
    HW = H * W
    x_flat = x_nchw.reshape(B, C_in, HW)                           # (B, Cin, HW)
    theta = jnp.einsum("oc,bcn->bon", w_theta, x_flat) + b_theta[None, :, None]
    phi = jnp.einsum("oc,bcn->bon", w_phi, x_flat) + b_phi[None, :, None]
    theta_t = jnp.transpose(theta, (0, 2, 1))                      # (B, HW, Ci)
    f = jnp.einsum("bnc,bcm->bnm", theta_t, phi)                   # (B, HW, HW)
    return jax.nn.softmax(f, axis=-1)


if __name__ == "__main__":
    B, C_in, C_inter, H, W = 2, 4, 2, 16, 16

    key = jax.random.PRNGKey(0)
    k_x, k_wt, k_bt, k_wp, k_bp = jax.random.split(key, 5)

    x = jax.random.normal(k_x, (B, C_in, H, W), dtype=jnp.float32)
    # nn.Conv2d 1x1 weight shape: (out_channels, in_channels).
    w_theta = jax.random.normal(k_wt, (C_inter, C_in), dtype=jnp.float32) * 0.1
    b_theta = jax.random.normal(k_bt, (C_inter,), dtype=jnp.float32) * 0.1
    w_phi = jax.random.normal(k_wp, (C_inter, C_in), dtype=jnp.float32) * 0.1
    b_phi = jax.random.normal(k_bp, (C_inter,), dtype=jnp.float32) * 0.1

    # tq=128 exercises the query tiling (HW=256 -> grid=(2, 2)).
    out = nlblock_forward(x, w_theta, b_theta, w_phi, b_phi, tq=128)
    out = jax.block_until_ready(out)

    ref = nlblock_reference(x, w_theta, b_theta, w_phi, b_phi)
    assert out.shape == (B, H * W, H * W)
    assert jnp.allclose(out, ref, atol=1e-5, rtol=1e-5), "mismatch vs reference"

    print("KERNEL_OK")
</pallas_src>

<mosaic_0001>
module attributes {stable_mosaic.version = 11 : i64} {
  func.func @nlblock_kernel(%arg0: i32, %arg1: i32, %arg2: memref<1x4x128xf32, #tpu.memory_space<vmem>>, %arg3: memref<1x4x256xf32, #tpu.memory_space<vmem>>, %arg4: memref<2x4xf32, #tpu.memory_space<vmem>>, %arg5: memref<2x1xf32, #tpu.memory_space<vmem>>, %arg6: memref<2x4xf32, #tpu.memory_space<vmem>>, %arg7: memref<2x1xf32, #tpu.memory_space<vmem>>, %arg8: memref<1x128x256xf32, #tpu.memory_space<vmem>>) attributes {dimension_semantics = [#tpu.dimension_semantics<parallel>, #tpu.dimension_semantics<parallel>], iteration_bounds = array<i64: 2, 2>, scalar_prefetch = 0 : i64, scratch_operands = 0 : i64, tpu.core_type = #tpu.core_type<tc>, window_params = [{transform_indices = @transform_0, window_bounds = array<i64: 1, 4, 128>}, {transform_indices = @transform_1, window_bounds = array<i64: 1, 4, 256>}, {pipeline_mode = #tpu.pipeline_mode<synchronous>, transform_indices = @transform_2, window_bounds = array<i64: 2, 4>}, {pipeline_mode = #tpu.pipeline_mode<synchronous>, transform_indices = @transform_3, window_bounds = array<i64: 2, 1>}, {pipeline_mode = #tpu.pipeline_mode<synchronous>, transform_indices = @transform_4, window_bounds = array<i64: 2, 4>}, {pipeline_mode = #tpu.pipeline_mode<synchronous>, transform_indices = @transform_5, window_bounds = array<i64: 2, 1>}, {transform_indices = @transform_6, window_bounds = array<i64: 1, 128, 256>}]} {
    %c0 = arith.constant 0 : index
    %c0_0 = arith.constant 0 : index
    %c0_1 = arith.constant 0 : index
    %0 = vector.load %arg2[%c0, %c0_0, %c0_1] : memref<1x4x128xf32, #tpu.memory_space<vmem>>, vector<1x4x128xf32>
    %1 = vector.shape_cast %0 : vector<1x4x128xf32> to vector<4x128xf32>
    %c0_2 = arith.constant 0 : index
    %c0_3 = arith.constant 0 : index
    %c0_4 = arith.constant 0 : index
    %2 = vector.load %arg3[%c0_2, %c0_3, %c0_4] : memref<1x4x256xf32, #tpu.memory_space<vmem>>, vector<1x4x256xf32>
    %3 = vector.shape_cast %2 : vector<1x4x256xf32> to vector<4x256xf32>
    %c0_5 = arith.constant 0 : index
    %c0_6 = arith.constant 0 : index
    %4 = vector.load %arg4[%c0_5, %c0_6] : memref<2x4xf32, #tpu.memory_space<vmem>>, vector<2x4xf32>
    %cst = arith.constant dense<0.000000e+00> : vector<2x128xf32>
    %5 = tpu.matmul %4, %1, %cst {dimension_numbers = #tpu.dot_dimension_numbers<[1], [0], [0], [1], [0, 0, 1, 1], [], []>} : vector<2x4xf32>, vector<4x128xf32>, vector<2x128xf32> -> vector<2x128xf32>
    %c0_7 = arith.constant 0 : index
    %c0_8 = arith.constant 0 : index
    %6 = vector.load %arg5[%c0_7, %c0_8] : memref<2x1xf32, #tpu.memory_space<vmem>>, vector<2x1xf32>
    %7 = vector.broadcast %6 : vector<2x1xf32> to vector<2x128xf32>
    %8 = arith.addf %5, %7 : vector<2x128xf32>
    %c0_9 = arith.constant 0 : index
    %c0_10 = arith.constant 0 : index
    %9 = vector.load %arg6[%c0_9, %c0_10] : memref<2x4xf32, #tpu.memory_space<vmem>>, vector<2x4xf32>
    %cst_11 = arith.constant dense<0.000000e+00> : vector<2x256xf32>
    %10 = tpu.matmul %9, %3, %cst_11 {dimension_numbers = #tpu.dot_dimension_numbers<[1], [0], [0], [1], [0, 0, 1, 1], [], []>} : vector<2x4xf32>, vector<4x256xf32>, vector<2x256xf32> -> vector<2x256xf32>
    %c0_12 = arith.constant 0 : index
    %c0_13 = arith.constant 0 : index
    %11 = vector.load %arg7[%c0_12, %c0_13] : memref<2x1xf32, #tpu.memory_space<vmem>>, vector<2x1xf32>
    %12 = vector.broadcast %11 : vector<2x1xf32> to vector<2x256xf32>
    %13 = arith.addf %10, %12 : vector<2x256xf32>
    %cst_14 = arith.constant dense<0.000000e+00> : vector<128x256xf32>
    %14 = tpu.matmul %8, %13, %cst_14 {dimension_numbers = #tpu.dot_dimension_numbers<[0], [0], [1], [1], [0, 1, 1, 1], [], []>} : vector<2x128xf32>, vector<2x256xf32>, vector<128x256xf32> -> vector<128x256xf32>
    %cst_15 = arith.constant dense<0xFF800000> : vector<128xf32>
    %15 = vector.multi_reduction <maximumf>, %14, %cst_15 [1] : vector<128x256xf32> to vector<128xf32>
    %16 = vector.shape_cast %15 : vector<128xf32> to vector<128x1xf32>
    %17 = vector.broadcast %16 : vector<128x1xf32> to vector<128x256xf32>
    %18 = arith.subf %14, %17 : vector<128x256xf32>
    %19 = math.exp %18 : vector<128x256xf32>
    %cst_16 = arith.constant dense<0.000000e+00> : vector<128xf32>
    %20 = vector.multi_reduction <add>, %19, %cst_16 [1] : vector<128x256xf32> to vector<128xf32>
    %21 = vector.shape_cast %20 : vector<128xf32> to vector<128x1xf32>
    %22 = tpu.reciprocal %21 {approx = true} : vector<128x1xf32> -> vector<128x1xf32>
    %23 = arith.mulf %21, %22 : vector<128x1xf32>
    %cst_17 = arith.constant 2.000000e+00 : f32
    %24 = vector.broadcast %cst_17 : f32 to vector<128x1xf32>
    %25 = arith.subf %24, %23 : vector<128x1xf32>
    %26 = arith.mulf %22, %25 : vector<128x1xf32>
    %27 = vector.broadcast %26 : vector<128x1xf32> to vector<128x256xf32>
    %28 = arith.mulf %19, %27 : vector<128x256xf32>
    %c0_18 = arith.constant 0 : index
    %c0_19 = arith.constant 0 : index
    %c0_20 = arith.constant 0 : index
    %29 = vector.load %arg8[%c0_18, %c0_19, %c0_20] : memref<1x128x256xf32, #tpu.memory_space<vmem>>, vector<1x128x256xf32>
    %30 = vector.shape_cast %29 : vector<1x128x256xf32> to vector<128x256xf32>
    %31 = vector.shape_cast %28 : vector<128x256xf32> to vector<1x128x256xf32>
    tpu.vector_store %arg8[%c0_18, %c0_19, %c0_20], %31 {strides = array<i32>} : memref<1x128x256xf32, #tpu.memory_space<vmem>>, vector<1x128x256xf32>,
    return
  }
  func.func @transform_0(%arg0: i32, %arg1: i32) -> (i32, i32, i32) {
    %c0_i32 = arith.constant 0 : i32
    %c0_i32_0 = arith.constant 0 : i32
    return %arg0, %c0_i32, %arg1 : i32, i32, i32
  }
  func.func @transform_1(%arg0: i32, %arg1: i32) -> (i32, i32, i32) {
    %c0_i32 = arith.constant 0 : i32
    %c0_i32_0 = arith.constant 0 : i32
    %c0_i32_1 = arith.constant 0 : i32
    return %arg0, %c0_i32, %c0_i32_0 : i32, i32, i32
  }
  func.func @transform_2(%arg0: i32, %arg1: i32) -> (i32, i32) {
    %c0_i32 = arith.constant 0 : i32
    %c0_i32_0 = arith.constant 0 : i32
    %c0_i32_1 = arith.constant 0 : i32
    return %c0_i32, %c0_i32_0 : i32, i32
  }
  func.func @transform_3(%arg0: i32, %arg1: i32) -> (i32, i32) {
    %c0_i32 = arith.constant 0 : i32
    %c0_i32_0 = arith.constant 0 : i32
    %c0_i32_1 = arith.constant 0 : i32
    return %c0_i32, %c0_i32_0 : i32, i32
  }
  func.func @transform_4(%arg0: i32, %arg1: i32) -> (i32, i32) {
    %c0_i32 = arith.constant 0 : i32
    %c0_i32_0 = arith.constant 0 : i32
    %c0_i32_1 = arith.constant 0 : i32
    return %c0_i32, %c0_i32_0 : i32, i32
  }
  func.func @transform_5(%arg0: i32, %arg1: i32) -> (i32, i32) {
    %c0_i32 = arith.constant 0 : i32
    %c0_i32_0 = arith.constant 0 : i32
    %c0_i32_1 = arith.constant 0 : i32
    return %c0_i32, %c0_i32_0 : i32, i32
  }
  func.func @transform_6(%arg0: i32, %arg1: i32) -> (i32, i32, i32) {
    %c0_i32 = arith.constant 0 : i32
    %c0_i32_0 = arith.constant 0 : i32
    return %arg0, %arg1, %c0_i32 : i32, i32, i32
  }
}

</mosaic_0001>

<bundles_post_ra>
// kernel: tpu_custom_call.1
= control target key start
LH: loop header
LB: loop body
LE: loop exit
PB: predicated region body
PF: predicated region fallthrough
CT: control target
= control target key end

     0   :  { %s2277_s0 = inlined_call_operand.hbm [shape: f32[2,4,256], index: 0, kind: input, shape index: {}]   ;;  %s2278_s1 = inlined_call_operand.hbm [shape: f32[2,4,256], index: 1, kind: input, shape index: {}]   ;;  %s2279_s2 = inlined_call_operand.vmem [shape: f32[2,4], index: 2, kind: input, shape index: {}]   ;;  %s2280_s3 = inlined_call_operand.vmem [shape: f32[2,1], index: 3, kind: input, shape index: {}]   ;;  %s2281_s4 = inlined_call_operand.vmem [shape: f32[2,4], index: 4, kind: input, shape index: {}]   ;;  %s2282_s5 = inlined_call_operand.vmem [shape: f32[2,1], index: 5, kind: input, shape index: {}]   ;;  %s2283_s6 = inlined_call_operand.hbm [shape: f32[2,256,256], index: 6, kind: output, shape index: {}]  }
   0x1   :  { %2292 = sst [smem:[#allocation17_spill]] %s2282_s5 }
   0x2   :  { %2293 = sst [smem:[#allocation18_spill]] %s2283_s6 }
   0x3   :  { %11 = vsyncpa [#allocation3], 0 }
   0x4   :  { %13 = vsyncpa [#allocation3 + $0x1], 0 }
   0x5   :  { %14 = vsyncpa [#allocation6], 0 }
   0x6   :  { %16 = vsyncpa [#allocation6 + $0x1], 0 }
   0x7   :  { %17 = vsyncpa [#allocation4], 0 }
   0x8   :  { %19 = vsyncpa [#allocation4 + $0x1], 0  ;;  %s1686_s21 = smov 0   ;;  %s1688_s22 = smov 0  }
   0x9   :  { %s1690_s23 = smov 0   ;;  %s1692_s24 = smov 0  }
   0xa   :  { %s1694_s25 = smov 0   ;;  %s1696_s26 = smov 0  }
   0xb   :  { %s1698_s27 = smov 0   ;;  %s1700_s28 = smov 0  }
   0xc   :  { %s1702_s29 = smov 0   ;;  %s1704_s30 = smov 0  }
   0xd   :  { %s1706_s7 = smov 0  }
   0xe LB: > { %2294 = sst [smem:[#allocation11_spill]] %s1613_s24  ;;  %s1196_s8 = sadd.s32 4294967295, %s1641_s7   ;;  %s1641_s7 = sphi %s1706_s7, %s25_s7   ;;  %s1637_s30 = sphi %s1704_s30, %s2330_s30   ;;  %s1633_s29 = sphi %s1702_s29, %s2329_s29   ;;  %s1629_s28 = sphi %s1700_s28, %s2328_s28   ;;  %s1625_s27 = sphi %s1698_s27, %s2327_s27   ;;  %s1621_s26 = sphi %s1696_s26, %s2326_s26   ;;  %s1617_s25 = sphi %s1694_s25, %s2325_s25   ;;  %s1613_s24 = sphi %s1692_s24, %s2324_s24   ;;  %s1609_s23 = sphi %s1690_s23, %s2323_s23   ;;  %s1605_s22 = sphi %s1688_s22, %s2322_s22   ;;  %s1601_s21 = sphi %s1686_s21, %s2321_s21  }
   0xf   : > { %2295 = sst [smem:[#allocation12_spill]] %s1625_s27  ;;  %s1197_s9 = sadd.s32 4294967294, %s1641_s7  }
  0x10   : > { %2296 = sst [smem:[#allocation13_spill]] %s1629_s28  ;;  %s34_s10 = sadd.s32 1, %s1633_s29 }
  0x11   : > { %s37_s11 = sadd.s32 1, %s1637_s30  ;;  %p35_p0 = scmp.ge.s32.totalorder %s34_s10, 2 }
  0x12   : > { %s46_s12 = sadd.s32 1, %s1621_s26  ;;  %p53_p1 = scmp.ne.s32.totalorder %s1621_s26, %s1617_s25 }
  0x13   : > { %p2290_p2 = scmp.eq.s32.totalorder %s1641_s7, 0  ;;  %s2332_s10 = smov (%p35_p0, %s34_s10), 0 }
  0x14   : > { %2297 = sst [smem:[#allocation14_spill]] %s2332_s10  ;;  %s2334_s11 = smov (!%p35_p0, %s37_s11), %s1637_s30 }
  0x15   : > { %s42_s13 = ssub.s32 %s1633_s29, %s2332_s10  ;;  %p1756_p3 = por %p2290_p2, %p53_p1 }
  0x16   : > { %p39_p4 = scmp.ge.s32.totalorder %s2334_s11, 2  ;;  %p59_p5 = scmp.ne.s32.totalorder %s1617_s25, %s1613_s24 }
  0x17   : > { %p1762_p6 = scmp.eq.s32.totalorder %s1196_s8, 0  ;;  %p195_p7 = scmp.eq.s32.totalorder %s1196_s8, 3 }
  0x18   : > { %s2336_s11 = smov (%p39_p4, %s2334_s11), 0  ;;  %p201_p10 = scmp.eq.s32.totalorder %s1197_s9, 3 }
  0x19   : > { %2300 = sst [smem:[#allocation15_spill]] %s2336_s11  ;;  %p1770_p8 = por %p1762_p6, %p59_p5 }
  0x1a   : > { %p1774_p9 = por %p195_p7, %p53_p1  ;;  %s1780_s18 = ssub.s32 %s1637_s30, %s2336_s11 }
  0x1b   : > { %s43_s19 = sor.u32 %s42_s13, %s1780_s18  ;;  %p1784_p13 = por %p201_p10, %p59_p5 }
  0x1c   : > { %s2302_s17 = scalar_select %p1774_p9, 1, 0 }
  0x1d   : > { %p44_p12 = scmp.eq.s32.totalorder %s43_s19, 0  ;;  %p2291_p0 = scmp.lt.s32.totalorder %s1641_s7, 4 }
  0x1e   : > { %2303 = sst [smem:[#allocation16_spill]] %s2302_s17  ;;  %s233_s10 = sand.u32 1, %s1621_s26  }
  0x1f   : > { %s2304_s20 = scalar_select %p1784_p13, 1, 0 }
  0x20   : > { %s1790_s8 = scalar_select %p44_p12, %s1621_s26, %s46_s12  }
  0x21   : > { %s1201_s11 = sshll.u32 %s1637_s30, 1  ;;  %s1200_s24 = sshll.u32 %s233_s10, 2 }
  0x22   : > { %s242_s6 = sadd.s32 %s1633_s29, %s1201_s11  ;;  %s237_s9 = scalar_lea.vmem [#allocation2], %s1200_s24 }
  0x23   : > { %s1202_s17 = sshll.u32 %s242_s6, 6  ;;  %s246_s28 = sshll.u32 %s237_s9, 4  ;;  %s247_s28 = int_to_ptr.vmem [resolvable:$true] %s246_s28 }
  0x24   : > { %s244_s5 = scalar_lea.hbm %s2277_s0, %s1202_s17  ;;  %p1802_p1 = pnand %p2291_p0, %p1756_p3 }
  0x25   : > { %p1206_p4 = scmp.ge.s32.totalorder %s1641_s7, 1  ;;  %p270_p5 = scmp.lt.s32.totalorder %s1641_s7, 5 }
  0x26   : > { %s234_s12 = scalar_lea.sflag [#allocation3], %s233_s10  ;;  %p1463_p7 = pneg %p1802_p1 }
  0x27   : > { %s1474_s6 = scalar_lea.vmem %s247_s28, 64  ;;  %s1643_s24 = smov [#allocation2]  }
  0x28   : > { %p1475_p10 = scmp.ne.s32.totalorder %s247_s28, %s1474_s6  ;;  %s1479_s27 = sshll.u32 %s1643_s24, 4  ;;  %s1480_s27 = int_to_ptr.vmem [resolvable:$false] %s1479_s27 }
  0x29   : > { %s1481_s11 = scalar_lea.vmem %s1480_s27, 128  ;;  %p1482_p11 = scmp.lt.s32.totalorder %s247_s28, %s1480_s27 }
  0x2a   : > { %p1477_p12 = pnand %p1475_p10, %p1463_p7  ;;  %p1483_p13 = scmp.lt.s32.totalorder %s1481_s11, %s1474_s6 }
  0x2c   : > { %p1478_p2 = pneg %p1477_p12  ;;  %p1484_p3 = por %p1483_p13, %p1482_p11 }
  0x2e   : > { %p1485_p0 = pnand %p1484_p3, %p1478_p2 }
  0x30   : > { %1488 = shalt.err (!%p1485_p0)
}
  0x31   : > { %1260 = dma.hbm_to_vmem [thread:$0]  (!%p1802_p1), %s244_s5, 64, %s247_s28, %s234_s12  }
  0x32   : > { %p1816_p2 = pnand %p1206_p4, %p270_p5  ;;  %s72_s14 = sadd.s32 1, %s1609_s23 }
  0x33   : > { %p2307_p11 = scmp.eq.s32.totalorder %s1780_s18, 0  ;;  %p79_p13 = scmp.ne.s32.totalorder %s1609_s23, %s1605_s22 }
  0x34   : > { %p85_p0 = scmp.ne.s32.totalorder %s1605_s22, %s1601_s21  ;;  %s253_s9 = sand.u32 1, %s1609_s23  }
  0x35   : > { %s1824_s17 = scalar_select %p2307_p11, %s1609_s23, %s72_s14  }
  0x36   : > { %s1240_s13 = sshll.u32 %s1637_s30, 7  ;;  %p2308_p7 = scmp.eq.s32.totalorder %s1641_s7, 0 }
  0x37   : > { %p1836_p12 = por %p85_p0, %p1762_p6  ;;  %s1203_s5 = sshll.u32 %s253_s9, 3 }
  0x38   : > { %p81_p10 = por %p79_p13, %p2308_p7  ;;  %s263_s6 = scalar_lea.hbm %s2278_s1, %s1240_s13 }
  0x39   : > { %s257_s24 = scalar_lea.vmem [#allocation5], %s1203_s5  ;;  %p2310_p1 = scmp.lt.s32.totalorder %s1641_s7, 4 }
  0x3a   : > { %s265_s18 = sshll.u32 %s257_s24, 4  ;;  %s254_s21 = scalar_lea.sflag [#allocation6], %s253_s9  ;;  %s266_s18 = int_to_ptr.vmem [resolvable:$true] %s265_s18 }
  0x3b   : > { %p1845_p4 = pnand %p2310_p1, %p81_p10  ;;  %s1502_s15 = scalar_lea.vmem %s266_s18, 128 }
  0x3c   : > { %p1503_p5 = scmp.ne.s32.totalorder %s266_s18, %s1502_s15  ;;  %s1644_s11 = smov [#allocation5]  }
  0x3d   : > { %p1491_p6 = pneg %p1845_p4  ;;  %s1507_s14 = sshll.u32 %s1644_s11, 4  ;;  %s1508_s14 = int_to_ptr.vmem [resolvable:$false] %s1507_s14 }
  0x3e   : > { %s1509_s13 = scalar_lea.vmem %s1508_s14, 256  ;;  %p1510_p13 = scmp.lt.s32.totalorder %s266_s18, %s1508_s14 }
  0x3f   : > { %p1505_p3 = pnand %p1503_p5, %p1491_p6  ;;  %p1511_p0 = scmp.lt.s32.totalorder %s1509_s13, %s1502_s15 }
  0x41   : > { %p1506_p11 = pneg %p1505_p3  ;;  %p1512_p7 = por %p1511_p0, %p1510_p13 }
  0x43   : > { %p1513_p10 = pnand %p1512_p7, %p1506_p11 }
  0x45   : > { %1516 = shalt.err (!%p1513_p10)
}
  0x46   : > { %1263 = dma.hbm_to_vmem [thread:$0]  (!%p1845_p4), %s263_s6, 128, %s266_s18, %s254_s21  }
  0x47   : > { %274 = sbr.rel (%p1816_p2) target bundleno = 995 (0x3e3), region = 44  ;;  %s1856_s9 = sand.u32 (!%p1816_p2), 1, %s1617_s25  }
  0x48   : > { %s1207_s5 = sshll.u32 (!%p1816_p2), %s1856_s9, 2  ;;  %s277_s28 = scalar_lea.sflag (!%p1816_p2), [#allocation3], %s1856_s9 }
  0x49   : > { %s280_s12 = scalar_lea.vmem (!%p1816_p2), [#allocation2], %s1207_s5 }
  0x4c   : > { %1588 = dma.done.wait (%p1770_p8), %s277_s28, 64  }
  0x4d   : > { %1590 = vsyncadd (%p1770_p8), %s277_s28, 4294967232  ;;  %s285_s6 = sand.u32 1, %s1605_s22  }
  0x4e   : > { %s1208_s24 = sshll.u32 %s285_s6, 3  ;;  %s286_s10 = scalar_lea.sflag [#allocation6], %s285_s6 }
  0x4f   : > { %s289_s18 = scalar_lea.vmem [#allocation5], %s1208_s24 }
  0x50   : > { %1592 = dma.done.wait (%p1836_p12), %s286_s10, 128  }
  0x51   : > { %1594 = vsyncadd (%p1836_p12), %s286_s10, 4294967168  ;;  %v1645_v0 = vmov 0.0   ;;  %vm1646_vm0 = vmmov 0   ;;  %v1647_v1 = vmov 0   ;;  %vm337_vm1 = vcmask 1043456   ;;  %v325_v4 = vld [vmem:[%s289_s18] sm:$0xff] }
  0x52   : > { %1244 = vmatprep.subr.mxu0 %v1645_v0  ;;  %1246 = vmatprep.mubr.msk.f32.mxu0 %vm1646_vm0, %v1645_v0  ;;  %vm333_vm2 = vcmask 31744   ;;  %v324_v2 = vld [vmem:[%s280_s12] sm:$0xf]  ;;  %v419_v5 = vcombine.high %v325_v4, %v325_v4  ;;  %s2312_s5 = sld [smem:[#allocation17_spill]]  ;;  %vm579_vm3 = vcmask 1041408   ;;  %vm530_vm4 = vcmask 15360  }
  0x53   : > { %491 = vmatprep.mubr.f32.mxu1 %v1645_v0  ;;  %1363 = vset.pattern.permute.xlu0 %v1647_v1  ;;  %v326_v3 = vld [vmem:[%s2279_s2] sm:$0x3]  ;;  %s1209_s28 = sshll.u32 %s1856_s9, 8  ;;  %s2313_s6 = sld [smem:[#allocation12_spill]] }
  0x54   : > { %1245 = vmatpush3.msk.msra.mxu0 %vm337_vm1, %v324_v2  ;;  %v327_v6 = vld [vmem:[%s2280_s3] sm:$0x3]  ;;  %1212 = vmatprep.subr.msk.mxu1 %vm337_vm1, %v419_v5  ;;  %s2143_s12 = scalar_lea.vmem [#allocation7], %s1209_s28  ;;  %s2314_s24 = sld [smem:[#allocation13_spill]] }
  0x55   : > { %1247 = vmatmul.mubr.msk.f32.vlgmr.msra.gmra.mxu0 %vm333_vm2, %v326_v3  ;;  %v411_v7 = vld [vmem:[%s2281_s4] sm:$0x3]  ;;  %330 = vperm.xlu0 %1363, %v327_v6   ;;  %s1084_s21 = sshll.u32 %s2143_s12, 4  ;;  %s2316_s14 = sld [smem:[#allocation18_spill]]  ;;  %s2211_s21 = int_to_ptr.vmem [resolvable:$true] %s1084_s21 }
  0x56   : > { %650 = vmatprep.mubr.f32.mxu0 %v1645_v0  ;;  %1213 = vmatpush1.msk.msra.mxu1 %vm337_vm1, %v325_v4  ;;  %s1517_s28 = scalar_lea.vmem %s2211_s21, 4096 }
  0x57   : > { %1214 = vmatmul.mubr.msk.f32.vlgmr.msra.gmra.mxu1 %vm333_vm2, %v411_v7  ;;  %p1518_p8 = scmp.ne.s32.totalorder %s2211_s21, %s1517_s28 }
  0x58   : > { %v412_v8 = vld [vmem:[%s2312_s5] sm:$0x3]  ;;  %698 = vmatprep.mubr.f32.mxu1 %v1645_v0  ;;  %s1068_s5 = scalar_lea.sflag [#allocation4], %s1856_s9 }
  0x59   : > { %415 = vperm.xlu0 %1363, %v412_v8   ;;  %s1241_s10 = sshll.u32 %s2313_s6, 5  ;;  %p1519_p2 = pnand %p1518_p8, %p1774_p9 }
  0x5a   : > { %s1236_s18 = sshll.u32 %s2314_s24, 6  ;;  %s1648_s6 = smov [#allocation7]  }
  0x5b   : > { %s1081_s16 = sadd.s32 %s1241_s10, %s1236_s18  ;;  %p1520_p12 = pneg %p1519_p2 }
  0x5c   : > { %s1237_s19 = sshll.u32 %s1081_s16, 7  ;;  %s1521_s24 = sshll.u32 %s1648_s6, 4  ;;  %s1522_s24 = int_to_ptr.vmem [resolvable:$false] %s1521_s24 }
  0x5d   : > { %s2209_s13 = scalar_lea.hbm %s2316_s14, %s1237_s19  ;;  %s1523_s10 = scalar_lea.vmem %s1522_s24, 8192 }
  0x5e   : > { %p1524_p1 = scmp.lt.s32.totalorder %s2211_s21, %s1522_s24  ;;  %p1525_p4 = scmp.lt.s32.totalorder %s1523_s10, %s1517_s28 }
  0x60   : > { %p1526_p6 = por %p1525_p4, %p1524_p1 }
  0x62   : > { %p1527_p5 = pnand %p1526_p6, %p1520_p12 }
  0xd0   : > { %v331_v9 = vpop.permute.xlu0 %330 }
  0xd4   : > { %v416_v14 = vpop.permute.xlu0 %415 }
 0x115   : > { %v407_v10 = vpop.f32.mrf.mxu0 }
 0x116   : > { %v408_v11 = vadd.f32 %v407_v10, %v331_v9 }
 0x117   : > { %v1248_v12 = vpop.f32.mrf.mxu0  ;;  %v493_v13 = vpop.f32.mrf.mxu1 }
 0x118   : > { %498 = vxpose.xlu1.b32.start.end [1/1] (short) %v408_v11, 128  ;;  %v494_v17 = vadd.f32 %v493_v13, %v416_v14 }
 0x119   : > { %v495_v15 = vpop.f32.mrf.mxu1 }
 0x11a   : > { %v496_v16 = vadd.f32 %v495_v15, %v416_v14 }
 0x11c   : > { %1215 = vmatprep.subr.msk.mxu0 %vm579_vm3, %v496_v16  ;;  %1249 = vmatprep.subr.msk.mxu1 %vm579_vm3, %v496_v16 }
 0x11d   : > { %1216 = vmatpush1.msk.msra.mxu0 %vm579_vm3, %v494_v17  ;;  %1250 = vmatpush1.msk.msra.mxu1 %vm579_vm3, %v494_v17 }
 0x194   : > { %v514_v18 = vpop.trf.xlu1 }
 0x195   : > { %1217 = vmatmul.mubr.msk.f32.vlgmr.msra.gmra.mxu0 %vm530_vm4, %v514_v18 }
 0x196   : > { %656 = vmatprep.mubr.f32.mxu0 %v1645_v0 }
 0x198   : > { %v515_v19 = vpop.trf.xlu1 }
 0x199   : > { %1218 = vmatmul.mubr.msk.f32.gmra.mxu0 %vm530_vm4, %v515_v19 }
 0x19a   : > { %662 = vmatprep.mubr.f32.mxu0 %v1645_v0 }
 0x19c   : > { %v516_v20 = vpop.trf.xlu1 }
 0x19d   : > { %1219 = vmatmul.mubr.msk.f32.gmra.mxu0 %vm530_vm4, %v516_v20 }
 0x19e   : > { %668 = vmatprep.mubr.f32.mxu0 %v1645_v0 }
 0x1a0   : > { %v517_v21 = vpop.trf.xlu1 }
 0x1a1   : > { %1220 = vmatmul.mubr.msk.f32.gmra.mxu0 %vm530_vm4, %v517_v21 }
 0x1a2   : > { %674 = vmatprep.mubr.f32.mxu0 %v1645_v0 }
 0x1a4   : > { %v518_v22 = vpop.trf.xlu1 }
 0x1a5   : > { %1221 = vmatmul.mubr.msk.f32.gmra.mxu0 %vm530_vm4, %v518_v22 }
 0x1a6   : > { %680 = vmatprep.mubr.f32.mxu0 %v1645_v0 }
 0x1a8   : > { %v519_v23 = vpop.trf.xlu1 }
 0x1a9   : > { %1222 = vmatmul.mubr.msk.f32.gmra.mxu0 %vm530_vm4, %v519_v23 }
 0x1aa   : > { %686 = vmatprep.mubr.f32.mxu0 %v1645_v0 }
 0x1ac   : > { %v520_v24 = vpop.trf.xlu1 }
 0x1ad   : > { %1223 = vmatmul.mubr.msk.f32.gmra.mxu0 %vm530_vm4, %v520_v24 }
 0x1ae   : > { %692 = vmatprep.mubr.f32.mxu0 %v1645_v0 }
 0x1b0   : > { %v521_v25 = vpop.trf.xlu1 }
 0x1b1   : > { %1224 = vmatmul.mubr.msk.f32.gmra.mxu0 %vm530_vm4, %v521_v25 }
 0x1b4   : > { %v522_v26 = vpop.trf.xlu1 }
 0x1b5   : > { %1225 = vmatmul.mubr.msk.f32.vlgmr.msra.gmra.mxu1 %vm530_vm4, %v522_v26 }
 0x1b6   : > { %704 = vmatprep.mubr.f32.mxu1 %v1645_v0 }
 0x1b8   : > { %v523_v27 = vpop.trf.xlu1 }
 0x1b9   : > { %1226 = vmatmul.mubr.msk.f32.gmra.mxu1 %vm530_vm4, %v523_v27 }
 0x1ba   : > { %710 = vmatprep.mubr.f32.mxu1 %v1645_v0 }
 0x1bc   : > { %v524_v28 = vpop.trf.xlu1 }
 0x1bd   : > { %1227 = vmatmul.mubr.msk.f32.gmra.mxu1 %vm530_vm4, %v524_v28 }
 0x1be   : > { %716 = vmatprep.mubr.f32.mxu1 %v1645_v0 }
 0x1c0   : > { %v525_v29 = vpop.trf.xlu1 }
 0x1c1   : > { %1228 = vmatmul.mubr.msk.f32.gmra.mxu1 %vm530_vm4, %v525_v29 }
 0x1c2   : > { %722 = vmatprep.mubr.f32.mxu1 %v1645_v0 }
 0x1c4   : > { %v526_v30 = vpop.trf.xlu1 }
 0x1c5   : > { %1229 = vmatmul.mubr.msk.f32.gmra.mxu1 %vm530_vm4, %v526_v30 }
 0x1c6   : > { %728 = vmatprep.mubr.f32.mxu1 %v1645_v0 }
 0x1c8   : > { %v527_v31 = vpop.trf.xlu1 }
 0x1c9   : > { %1230 = vmatmul.mubr.msk.f32.gmra.mxu1 %vm530_vm4, %v527_v31 }
 0x1ca   : > { %734 = vmatprep.mubr.f32.mxu1 %v1645_v0 }
 0x1cc   : > { %v528_v32 = vpop.trf.xlu1 }
 0x1cd   : > { %1231 = vmatmul.mubr.msk.f32.gmra.mxu1 %vm530_vm4, %v528_v32 }
 0x1ce   : > { %740 = vmatprep.mubr.f32.mxu1 %v1645_v0 }
 0x1d0   : > { %v529_v33 = vpop.trf.xlu1 }
 0x1d1   : > { %1232 = vmatmul.mubr.msk.f32.gmra.mxu1 %vm530_vm4, %v529_v33 }
 0x255   : > { %v1916_v34 = vpop.f32.mrf.mxu0 }
 0x257   : > { %v1918_v35 = vpop.f32.mrf.mxu0 }
 0x258   : > { %v747_v36 = vmax.f32 %v1916_v34, %v1918_v35 }
 0x259   : > { %v1922_v37 = vpop.f32.mrf.mxu0 }
 0x25a   : > { %748 = vmax.xlane.f32.xlu1 %v747_v36 }
 0x25b   : > { %v1924_v38 = vpop.f32.mrf.mxu0 }
 0x25c   : > { %v750_v39 = vmax.f32 %v1922_v37, %v1924_v38 }
 0x25d   : > { %v1928_v40 = vpop.f32.mrf.mxu0 }
 0x25e   : > { %751 = vmax.xlane.f32.xlu0 %v750_v39 }
 0x25f   : > { %v1930_v41 = vpop.f32.mrf.mxu0 }
 0x260   : > { %v753_v42 = vmax.f32 %v1928_v40, %v1930_v41 }
 0x261   : > { %v1934_v43 = vpop.f32.mrf.mxu0 }
 0x262   : > { %754 = vmax.xlane.f32.xlu0 %v753_v42 }
 0x263   : > { %v1936_v44 = vpop.f32.mrf.mxu0 }
 0x264   : > { %v756_v45 = vmax.f32 %v1934_v43, %v1936_v44 }
 0x265   : > { %v1940_v46 = vpop.f32.mrf.mxu0 }
 0x266   : > { %757 = vmax.xlane.f32.xlu0 %v756_v45 }
 0x267   : > { %v1942_v47 = vpop.f32.mrf.mxu0 }
 0x268   : > { %v759_v48 = vmax.f32 %v1940_v46, %v1942_v47 }
 0x269   : > { %v1946_v49 = vpop.f32.mrf.mxu0 }
 0x26a   : > { %760 = vmax.xlane.f32.xlu0 %v759_v48 }
 0x26b   : > { %v1948_v50 = vpop.f32.mrf.mxu0 }
 0x26c   : > { %v762_v51 = vmax.f32 %v1946_v49, %v1948_v50 }
 0x26d   : > { %v1952_v52 = vpop.f32.mrf.mxu0 }
 0x26e   : > { %763 = vmax.xlane.f32.xlu0 %v762_v51 }
 0x26f   : > { %v1954_v53 = vpop.f32.mrf.mxu0 }
 0x270   : > { %v765_v54 = vmax.f32 %v1952_v52, %v1954_v53 }
 0x271   : > { %v1958_v55 = vpop.f32.mrf.mxu0 }
 0x272   : > { %766 = vmax.xlane.f32.xlu0 %v765_v54 }
 0x273   : > { %v1960_v56 = vpop.f32.mrf.mxu0 }
 0x274   : > { %v768_v57 = vmax.f32 %v1958_v55, %v1960_v56 }
 0x275   : > { %v1964_v58 = vpop.f32.mrf.mxu1 }
 0x276   : > { %769 = vmax.xlane.f32.xlu0 %v768_v57 }
 0x277   : > { %v1966_v59 = vpop.f32.mrf.mxu1 }
 0x278   : > { %v771_v60 = vmax.f32 %v1964_v58, %v1966_v59 }
 0x279   : > { %v1970_v61 = vpop.f32.mrf.mxu1 }
 0x27a   : > { %772 = vmax.xlane.f32.xlu0 %v771_v60 }
 0x27b   : > { %v1972_v62 = vpop.f32.mrf.mxu1 }
 0x27c   : > { %v774_v63 = vmax.f32 %v1970_v61, %v1972_v62 }
 0x27d   : > { %v1976_v0 = vpop.f32.mrf.mxu1 }
 0x27e   : > { %775 = vmax.xlane.f32.xlu0 %v774_v63 }
 0x27f   : > { %v1978_v1 = vpop.f32.mrf.mxu1 }
 0x280   : > { %v777_v2 = vmax.f32 %v1976_v0, %v1978_v1 }
 0x281   : > { %v1982_v3 = vpop.f32.mrf.mxu1 }
 0x282   : > { %778 = vmax.xlane.f32.xlu0 %v777_v2 }
 0x283   : > { %v1984_v4 = vpop.f32.mrf.mxu1 }
 0x284   : > { %v780_v5 = vmax.f32 %v1982_v3, %v1984_v4 }
 0x285   : > { %v1988_v6 = vpop.f32.mrf.mxu1 }
 0x286   : > { %781 = vmax.xlane.f32.xlu0 %v780_v5 }
 0x287   : > { %v1990_v7 = vpop.f32.mrf.mxu1 }
 0x288   : > { %v783_v8 = vmax.f32 %v1988_v6, %v1990_v7 }
 0x289   : > { %v1994_v9 = vpop.f32.mrf.mxu1 }
 0x28a   : > { %784 = vmax.xlane.f32.xlu0 %v783_v8 }
 0x28b   : > { %v1996_v10 = vpop.f32.mrf.mxu1 }
 0x28c   : > { %v786_v11 = vmax.f32 %v1994_v9, %v1996_v10 }
 0x28d   : > { %v2000_v12 = vpop.f32.mrf.mxu1 }
 0x28e   : > { %787 = vmax.xlane.f32.xlu0 %v786_v11 }
 0x28f   : > { %v2002_v13 = vpop.f32.mrf.mxu1 }
 0x290   : > { %v789_v14 = vmax.f32 %v2000_v12, %v2002_v13 }
 0x291   : > { %v2006_v15 = vpop.f32.mrf.mxu1 }
 0x292   : > { %790 = vmax.xlane.f32.xlu0 %v789_v14 }
 0x293   : > { %v2008_v16 = vpop.f32.mrf.mxu1 }
 0x294   : > { %v792_v17 = vmax.f32 %v2006_v15, %v2008_v16 }
 0x296   : > { %793 = vmax.xlane.f32.xlu0 %v792_v17 }
 0x2e3   : > { %v749_v18 = vpop.xlane.xlu1 %748 }
 0x2e4   : > { %v795_v19 = vsub.f32 %v1916_v34, %v749_v18  ;;  %v796_v20 = vsub.f32 %v1918_v35, %v749_v18 }
 0x2e6   : > { %v827_v21 = vmul.f32 1.442695, %v795_v19  ;;  %v829_v22 = vmul.f32 1.442695, %v796_v20 }
 0x2e7   : > { %v752_v23 = vpop.xlane.xlu0 %751 }
 0x2e8   : > { %1365 = vpow2.f32 %v827_v21  ;;  %v797_v24 = vsub.f32 %v1922_v37, %v752_v23  ;;  %v798_v25 = vsub.f32 %v1924_v38, %v752_v23 }
 0x2e9   : > { %1367 = vpow2.f32 %v829_v22 }
 0x2ea   : > { %v831_v26 = vmul.f32 1.442695, %v797_v24  ;;  %v833_v27 = vmul.f32 1.442695, %v798_v25 }
 0x2eb   : > { %v755_v28 = vpop.xlane.xlu0 %754 }
 0x2ec   : > { %1369 = vpow2.f32 %v831_v26  ;;  %v799_v29 = vsub.f32 %v1928_v40, %v755_v28  ;;  %v800_v30 = vsub.f32 %v1930_v41, %v755_v28 }
 0x2ed   : > { %1371 = vpow2.f32 %v833_v27 }
 0x2ee   : > { %v835_v31 = vmul.f32 1.442695, %v799_v29  ;;  %v837_v32 = vmul.f32 1.442695, %v800_v30 }
 0x2ef   : > { %v758_v33 = vpop.xlane.xlu0 %757 }
 0x2f0   : > { %1373 = vpow2.f32 %v835_v31  ;;  %v801_v34 = vsub.f32 %v1934_v43, %v758_v33  ;;  %v802_v35 = vsub.f32 %v1936_v44, %v758_v33 }
 0x2f1   : > { %1375 = vpow2.f32 %v837_v32 }
 0x2f2   : > { %v839_v36 = vmul.f32 1.442695, %v801_v34  ;;  %v841_v37 = vmul.f32 1.442695, %v802_v35 }
 0x2f3   : > { %v761_v38 = vpop.xlane.xlu0 %760 }
 0x2f4   : > { %1377 = vpow2.f32 %v839_v36  ;;  %v803_v39 = vsub.f32 %v1940_v46, %v761_v38  ;;  %v804_v40 = vsub.f32 %v1942_v47, %v761_v38 }
 0x2f5   : > { %v2022_v42 = vpop.eup %1365  ;;  %1379 = vpow2.f32 %v841_v37 }
 0x2f6   : > { %v2024_v41 = vpop.eup %1367  ;;  %v843_v45 = vmul.f32 1.442695, %v803_v39  ;;  %v845_v48 = vmul.f32 1.442695, %v804_v40 }
 0x2f7   : > { %v764_v51 = vpop.xlane.xlu0 %763  ;;  %v891_v43 = vadd.f32 %v2024_v41, %v2022_v42 }
 0x2f8   : > { %1381 = vpow2.f32 %v843_v45  ;;  %v805_v44 = vsub.f32 %v1946_v49, %v764_v51  ;;  %v806_v54 = vsub.f32 %v1948_v50, %v764_v51 }
 0x2f9   : > { %v2030_v57 = vpop.eup %1369  ;;  %1383 = vpow2.f32 %v845_v48  ;;  %892 = vadd.xlane.f32.xlu0 %v891_v43 }
 0x2fa   : > { %v2032_v46 = vpop.eup %1371  ;;  %v847_v47 = vmul.f32 1.442695, %v805_v44  ;;  %v849_v60 = vmul.f32 1.442695, %v806_v54 }
 0x2fb   : > { %v767_v63 = vpop.xlane.xlu0 %766  ;;  %v894_v2 = vadd.f32 %v2032_v46, %v2030_v57 }
 0x2fc   : > { %1385 = vpow2.f32 %v847_v47  ;;  %v807_v5 = vsub.f32 %v1952_v52, %v767_v63  ;;  %v808_v8 = vsub.f32 %v1954_v53, %v767_v63 }
 0x2fd   : > { %v2038_v49 = vpop.eup %1373  ;;  %1387 = vpow2.f32 %v849_v60  ;;  %895 = vadd.xlane.f32.xlu0 %v894_v2 }
 0x2fe   : > { %v2040_v50 = vpop.eup %1375  ;;  %v851_v11 = vmul.f32 1.442695, %v807_v5  ;;  %v853_v14 = vmul.f32 1.442695, %v808_v8 }
 0x2ff   : > { %v770_v17 = vpop.xlane.xlu0 %769  ;;  %v897_v18 = vadd.f32 %v2040_v50, %v2038_v49 }
 0x300   : > { %1389 = vpow2.f32 %v851_v11  ;;  %v809_v19 = vsub.f32 %v1958_v55, %v770_v17  ;;  %v810_v20 = vsub.f32 %v1960_v56, %v770_v17 }
 0x301   : > { %v2046_v52 = vpop.eup %1377  ;;  %1391 = vpow2.f32 %v853_v14  ;;  %898 = vadd.xlane.f32.xlu0 %v897_v18 }
 0x302   : > { %v2048_v53 = vpop.eup %1379  ;;  %v855_v21 = vmul.f32 1.442695, %v809_v19  ;;  %v857_v22 = vmul.f32 1.442695, %v810_v20 }
 0x303   : > { %v773_v23 = vpop.xlane.xlu0 %772  ;;  %v900_v24 = vadd.f32 %v2048_v53, %v2046_v52 }
 0x304   : > { %1393 = vpow2.f32 %v855_v21  ;;  %v811_v25 = vsub.f32 %v1964_v58, %v773_v23  ;;  %v812_v26 = vsub.f32 %v1966_v59, %v773_v23 }
 0x305   : > { %v2054_v55 = vpop.eup %1381  ;;  %1395 = vpow2.f32 %v857_v22  ;;  %901 = vadd.xlane.f32.xlu1 %v900_v24 }
 0x306   : > { %v2056_v56 = vpop.eup %1383  ;;  %v859_v27 = vmul.f32 1.442695, %v811_v25  ;;  %v861_v28 = vmul.f32 1.442695, %v812_v26 }
 0x307   : > { %v776_v29 = vpop.xlane.xlu0 %775  ;;  %v903_v30 = vadd.f32 %v2056_v56, %v2054_v55 }
 0x308   : > { %1397 = vpow2.f32 %v859_v27  ;;  %v813_v31 = vsub.f32 %v1970_v61, %v776_v29  ;;  %v814_v32 = vsub.f32 %v1972_v62, %v776_v29 }
 0x309   : > { %v2062_v58 = vpop.eup %1385  ;;  %1399 = vpow2.f32 %v861_v28  ;;  %904 = vadd.xlane.f32.xlu0 %v903_v30 }
 0x30a   : > { %v2064_v59 = vpop.eup %1387  ;;  %v863_v33 = vmul.f32 1.442695, %v813_v31  ;;  %v865_v34 = vmul.f32 1.442695, %v814_v32 }
 0x30b   : > { %v779_v35 = vpop.xlane.xlu0 %778  ;;  %v906_v36 = vadd.f32 %v2064_v59, %v2062_v58 }
 0x30c   : > { %1401 = vpow2.f32 %v863_v33  ;;  %v815_v37 = vsub.f32 %v1976_v0, %v779_v35  ;;  %v816_v38 = vsub.f32 %v1978_v1, %v779_v35 }
 0x30d   : > { %v2070_v61 = vpop.eup %1389  ;;  %1403 = vpow2.f32 %v865_v34  ;;  %907 = vadd.xlane.f32.xlu1 %v906_v36 }
 0x30e   : > { %v2072_v62 = vpop.eup %1391  ;;  %v867_v39 = vmul.f32 1.442695, %v815_v37  ;;  %v869_v40 = vmul.f32 1.442695, %v816_v38 }
 0x30f   : > { %v782_v45 = vpop.xlane.xlu0 %781  ;;  %v909_v48 = vadd.f32 %v2072_v62, %v2070_v61 }
 0x310   : > { %1405 = vpow2.f32 %v867_v39  ;;  %v817_v51 = vsub.f32 %v1982_v3, %v782_v45  ;;  %v818_v43 = vsub.f32 %v1984_v4, %v782_v45 }
 0x311   : > { %v2078_v0 = vpop.eup %1393  ;;  %1407 = vpow2.f32 %v869_v40  ;;  %910 = vadd.xlane.f32.xlu0 %v909_v48 }
 0x312   : > { %v2080_v1 = vpop.eup %1395  ;;  %v871_v44 = vmul.f32 1.442695, %v817_v51  ;;  %v873_v54 = vmul.f32 1.442695, %v818_v43 }
 0x313   : > { %v785_v47 = vpop.xlane.xlu0 %784  ;;  %v912_v60 = vadd.f32 %v2080_v1, %v2078_v0 }
 0x314   : > { %1409 = vpow2.f32 %v871_v44  ;;  %v819_v63 = vsub.f32 %v1988_v6, %v785_v47  ;;  %v820_v2 = vsub.f32 %v1990_v7, %v785_v47 }
 0x315   : > { %v2086_v3 = vpop.eup %1397  ;;  %1411 = vpow2.f32 %v873_v54  ;;  %913 = vadd.xlane.f32.xlu1 %v912_v60 }
 0x316   : > { %v2088_v4 = vpop.eup %1399  ;;  %v875_v5 = vmul.f32 1.442695, %v819_v63  ;;  %v877_v8 = vmul.f32 1.442695, %v820_v2 }
 0x317   : > { %v788_v11 = vpop.xlane.xlu0 %787  ;;  %v915_v14 = vadd.f32 %v2088_v4, %v2086_v3 }
 0x318   : > { %1413 = vpow2.f32 %v875_v5  ;;  %v821_v17 = vsub.f32 %v1994_v9, %v788_v11  ;;  %v822_v18 = vsub.f32 %v1996_v10, %v788_v11 }
 0x319   : > { %v2094_v6 = vpop.eup %1401  ;;  %1415 = vpow2.f32 %v877_v8  ;;  %916 = vadd.xlane.f32.xlu0 %v915_v14 }
 0x31a   : > { %v2096_v7 = vpop.eup %1403  ;;  %v879_v19 = vmul.f32 1.442695, %v821_v17  ;;  %v881_v20 = vmul.f32 1.442695, %v822_v18 }
 0x31b   : > { %v791_v21 = vpop.xlane.xlu0 %790  ;;  %v918_v22 = vadd.f32 %v2096_v7, %v2094_v6 }
 0x31c   : > { %1417 = vpow2.f32 %v879_v19  ;;  %v823_v23 = vsub.f32 %v2000_v12, %v791_v21  ;;  %v824_v24 = vsub.f32 %v2002_v13, %v791_v21 }
 0x31d   : > { %v2102_v9 = vpop.eup %1405  ;;  %1419 = vpow2.f32 %v881_v20  ;;  %919 = vadd.xlane.f32.xlu1 %v918_v22 }
 0x31e   : > { %v2104_v10 = vpop.eup %1407  ;;  %v883_v25 = vmul.f32 1.442695, %v823_v23  ;;  %v885_v26 = vmul.f32 1.442695, %v824_v24 }
 0x31f   : > { %v794_v27 = vpop.xlane.xlu0 %793  ;;  %v921_v28 = vadd.f32 %v2104_v10, %v2102_v9 }
 0x320   : > { %1421 = vpow2.f32 %v883_v25  ;;  %v825_v29 = vsub.f32 %v2006_v15, %v794_v27  ;;  %v826_v30 = vsub.f32 %v2008_v16, %v794_v27 }
 0x321   : > { %v2110_v12 = vpop.eup %1409  ;;  %1423 = vpow2.f32 %v885_v26  ;;  %922 = vadd.xlane.f32.xlu0 %v921_v28 }
 0x322   : > { %v2112_v13 = vpop.eup %1411  ;;  %v887_v31 = vmul.f32 1.442695, %v825_v29  ;;  %v889_v32 = vmul.f32 1.442695, %v826_v30 }
 0x323   : > { %v924_v33 = vadd.f32 %v2112_v13, %v2110_v12 }
 0x324   : > { %1425 = vpow2.f32 %v887_v31 }
 0x325   : > { %v2116_v34 = vpop.eup %1413  ;;  %1427 = vpow2.f32 %v889_v32  ;;  %925 = vadd.xlane.f32.xlu1 %v924_v33 }
 0x326   : > { %v2118_v35 = vpop.eup %1415 }
 0x327   : > { %v927_v15 = vadd.f32 %v2118_v35, %v2116_v34 }
 0x329   : > { %v2122_v16 = vpop.eup %1417  ;;  %928 = vadd.xlane.f32.xlu0 %v927_v15 }
 0x32a   : > { %v2124_v36 = vpop.eup %1419 }
 0x32b   : > { %v930_v37 = vadd.f32 %v2124_v36, %v2122_v16 }
 0x32d   : > { %v2128_v38 = vpop.eup %1421  ;;  %931 = vadd.xlane.f32.xlu1 %v930_v37 }
 0x32e   : > { %v2130_v39 = vpop.eup %1423 }
 0x32f   : > { %v933_v40 = vadd.f32 %v2130_v39, %v2128_v38 }
 0x331   : > { %v2134_v45 = vpop.eup %1425  ;;  %934 = vadd.xlane.f32.xlu0 %v933_v40 }
 0x332   : > { %v2136_v48 = vpop.eup %1427 }
 0x333   : > { %v936_v51 = vadd.f32 %v2136_v48, %v2134_v45 }
 0x335   : > { %937 = vadd.xlane.f32.xlu1 %v936_v51 }
 0x382   : > { %v893_v43 = vpop.xlane.xlu0 %892 }
 0x383   : > { %1429 = vrcp.f32 %v893_v43 }
 0x386   : > { %v896_v44 = vpop.xlane.xlu0 %895 }
 0x387   : > { %1431 = vrcp.f32 %v896_v44 }
 0x38a   : > { %v899_v54 = vpop.xlane.xlu0 %898 }
 0x38b   : > { %1433 = vrcp.f32 %v899_v54 }
 0x38e   : > { %v902_v47 = vpop.xlane.xlu1 %901 }
 0x38f   : > { %1435 = vrcp.f32 %v902_v47 }
 0x390   : > { %v1430_v60 = vpop.eup %1429 }
 0x391   : > { %v955_v63 = vmul.f32 %v1430_v60, %v893_v43 }
 0x392   : > { %v905_v2 = vpop.xlane.xlu0 %904 }
 0x393   : > { %v971_v5 = vsub.f32 2.0, %v955_v63  ;;  %1437 = vrcp.f32 %v905_v2 }
 0x394   : > { %v1432_v8 = vpop.eup %1431 }
 0x395   : > { %v987_v11 = vmul.f32 %v1430_v60, %v971_v5  ;;  %v956_v14 = vmul.f32 %v1432_v8, %v896_v44 }
 0x396   : > { %v908_v17 = vpop.xlane.xlu1 %907 }
 0x397   : > { %v1003_v18 = vmul.f32 %v2022_v42, %v987_v11  ;;  %v1004_v19 = vmul.f32 %v2024_v41, %v987_v11  ;;  %v972_v20 = vsub.f32 2.0, %v956_v14  ;;  %1439 = vrcp.f32 %v908_v17 }
 0x398   : > { %v1434_v21 = vpop.eup %1433 }
 0x399   : > { %1035 = vst [vmem:[%s2143_s12] sm:$0xff] %v1003_v18  ;;  %1036 = vst [vmem:[%s2143_s12 + $0x8] sm:$0xff] %v1004_v19  ;;  %v988_v22 = vmul.f32 %v1432_v8, %v972_v20  ;;  %v957_v23 = vmul.f32 %v1434_v21, %v899_v54 }
 0x39a   : > { %v911_v24 = vpop.xlane.xlu0 %910 }
 0x39b   : > { %v1005_v25 = vmul.f32 %v2030_v57, %v988_v22  ;;  %v1006_v42 = vmul.f32 %v2032_v46, %v988_v22  ;;  %v973_v41 = vsub.f32 2.0, %v957_v23  ;;  %1441 = vrcp.f32 %v911_v24 }
 0x39c   : > { %v1436_v26 = vpop.eup %1435 }
 0x39d   : > { %1037 = vst [vmem:[%s2143_s12 + $0x10] sm:$0xff] %v1005_v25  ;;  %1038 = vst [vmem:[%s2143_s12 + $0x18] sm:$0xff] %v1006_v42  ;;  %v989_v27 = vmul.f32 %v1434_v21, %v973_v41  ;;  %v958_v28 = vmul.f32 %v1436_v26, %v902_v47 }
 0x39e   : > { %v914_v29 = vpop.xlane.xlu1 %913 }
 0x39f   : > { %v1007_v30 = vmul.f32 %v2038_v49, %v989_v27  ;;  %v1008_v31 = vmul.f32 %v2040_v50, %v989_v27  ;;  %v974_v32 = vsub.f32 2.0, %v958_v28  ;;  %1443 = vrcp.f32 %v914_v29 }
 0x3a0   : > { %v1438_v57 = vpop.eup %1437 }
 0x3a1   : > { %1039 = vst [vmem:[%s2143_s12 + $0x20] sm:$0xff] %v1007_v30  ;;  %1040 = vst [vmem:[%s2143_s12 + $0x28] sm:$0xff] %v1008_v31  ;;  %v990_v46 = vmul.f32 %v1436_v26, %v974_v32  ;;  %v959_v33 = vmul.f32 %v1438_v57, %v905_v2 }
 0x3a2   : > { %v917_v15 = vpop.xlane.xlu0 %916 }
 0x3a3   : > { %v1009_v37 = vmul.f32 %v2046_v52, %v990_v46  ;;  %v1010_v40 = vmul.f32 %v2048_v53, %v990_v46  ;;  %v975_v51 = vsub.f32 2.0, %v959_v33  ;;  %1445 = vrcp.f32 %v917_v15 }
 0x3a4   : > { %v1440_v49 = vpop.eup %1439 }
 0x3a5   : > { %1041 = vst [vmem:[%s2143_s12 + $0x30] sm:$0xff] %v1009_v37  ;;  %1042 = vst [vmem:[%s2143_s12 + $0x38] sm:$0xff] %v1010_v40  ;;  %v991_v50 = vmul.f32 %v1438_v57, %v975_v51  ;;  %v960_v43 = vmul.f32 %v1440_v49, %v908_v17 }
 0x3a6   : > { %v920_v44 = vpop.xlane.xlu1 %919 }
 0x3a7   : > { %v1011_v54 = vmul.f32 %v2054_v55, %v991_v50  ;;  %v1012_v47 = vmul.f32 %v2056_v56, %v991_v50  ;;  %v976_v60 = vsub.f32 2.0, %v960_v43  ;;  %1447 = vrcp.f32 %v920_v44 }
 0x3a8   : > { %v1442_v52 = vpop.eup %1441 }
 0x3a9   : > { %1043 = vst [vmem:[%s2143_s12 + $0x40] sm:$0xff] %v1011_v54  ;;  %1044 = vst [vmem:[%s2143_s12 + $0x48] sm:$0xff] %v1012_v47  ;;  %v992_v53 = vmul.f32 %v1440_v49, %v976_v60  ;;  %v961_v63 = vmul.f32 %v1442_v52, %v911_v24 }
 0x3aa   : > { %v923_v2 = vpop.xlane.xlu0 %922 }
 0x3ab   : > { %v1013_v5 = vmul.f32 %v2062_v58, %v992_v53  ;;  %v1014_v8 = vmul.f32 %v2064_v59, %v992_v53  ;;  %v977_v11 = vsub.f32 2.0, %v961_v63  ;;  %1449 = vrcp.f32 %v923_v2 }
 0x3ac   : > { %v1444_v55 = vpop.eup %1443 }
 0x3ad   : > { %1045 = vst [vmem:[%s2143_s12 + $0x50] sm:$0xff] %v1013_v5  ;;  %1046 = vst [vmem:[%s2143_s12 + $0x58] sm:$0xff] %v1014_v8  ;;  %v993_v56 = vmul.f32 %v1442_v52, %v977_v11  ;;  %v962_v14 = vmul.f32 %v1444_v55, %v914_v29 }
 0x3ae   : > { %v926_v17 = vpop.xlane.xlu1 %925 }
 0x3af   : > { %v1015_v18 = vmul.f32 %v2070_v61, %v993_v56  ;;  %v1016_v19 = vmul.f32 %v2072_v62, %v993_v56  ;;  %v978_v20 = vsub.f32 2.0, %v962_v14  ;;  %1451 = vrcp.f32 %v926_v17 }
 0x3b0   : > { %v1446_v58 = vpop.eup %1445 }
 0x3b1   : > { %1047 = vst [vmem:[%s2143_s12 + $0x60] sm:$0xff] %v1015_v18  ;;  %1048 = vst [vmem:[%s2143_s12 + $0x68] sm:$0xff] %v1016_v19  ;;  %v994_v59 = vmul.f32 %v1444_v55, %v978_v20  ;;  %v963_v21 = vmul.f32 %v1446_v58, %v917_v15 }
 0x3b2   : > { %v929_v22 = vpop.xlane.xlu0 %928 }
 0x3b3   : > { %v1017_v23 = vmul.f32 %v2078_v0, %v994_v59  ;;  %v1018_v24 = vmul.f32 %v2080_v1, %v994_v59  ;;  %v979_v25 = vsub.f32 2.0, %v963_v21  ;;  %1453 = vrcp.f32 %v929_v22 }
 0x3b4   : > { %v1448_v61 = vpop.eup %1447 }
 0x3b5   : > { %1049 = vst [vmem:[%s2143_s12 + $0x70] sm:$0xff] %v1017_v23  ;;  %1050 = vst [vmem:[%s2143_s12 + $0x78] sm:$0xff] %v1018_v24  ;;  %v995_v62 = vmul.f32 %v1446_v58, %v979_v25  ;;  %v964_v42 = vmul.f32 %v1448_v61, %v920_v44 }
 0x3b6   : > { %v932_v41 = vpop.xlane.xlu1 %931 }
 0x3b7   : > { %v1019_v26 = vmul.f32 %v2086_v3, %v995_v62  ;;  %v1020_v27 = vmul.f32 %v2088_v4, %v995_v62  ;;  %v980_v28 = vsub.f32 2.0, %v964_v42  ;;  %1455 = vrcp.f32 %v932_v41 }
 0x3b8   : > { %v1450_v0 = vpop.eup %1449 }
 0x3b9   : > { %1051 = vst [vmem:[%s2143_s12 + $0x80] sm:$0xff] %v1019_v26  ;;  %1052 = vst [vmem:[%s2143_s12 + $0x88] sm:$0xff] %v1020_v27  ;;  %v996_v1 = vmul.f32 %v1448_v61, %v980_v28  ;;  %v965_v29 = vmul.f32 %v1450_v0, %v923_v2 }
 0x3ba   : > { %v935_v30 = vpop.xlane.xlu0 %934 }
 0x3bb   : > { %v1021_v31 = vmul.f32 %v2094_v6, %v996_v1  ;;  %v1022_v32 = vmul.f32 %v2096_v7, %v996_v1  ;;  %v981_v57 = vsub.f32 2.0, %v965_v29  ;;  %1457 = vrcp.f32 %v935_v30 }
 0x3bc   : > { %v1452_v3 = vpop.eup %1451 }
 0x3bd   : > { %1053 = vst [vmem:[%s2143_s12 + $0x90] sm:$0xff] %v1021_v31  ;;  %1054 = vst [vmem:[%s2143_s12 + $0x98] sm:$0xff] %v1022_v32  ;;  %v997_v4 = vmul.f32 %v1450_v0, %v981_v57  ;;  %v966_v46 = vmul.f32 %v1452_v3, %v926_v17 }
 0x3be   : > { %v938_v33 = vpop.xlane.xlu1 %937 }
 0x3bf   : > { %v1023_v15 = vmul.f32 %v2102_v9, %v997_v4  ;;  %v1024_v37 = vmul.f32 %v2104_v10, %v997_v4  ;;  %v982_v40 = vsub.f32 2.0, %v966_v46  ;;  %1459 = vrcp.f32 %v938_v33 }
 0x3c0   : > { %v1454_v6 = vpop.eup %1453 }
 0x3c1   : > { %1055 = vst [vmem:[%s2143_s12 + $0xa0] sm:$0xff] %v1023_v15  ;;  %1056 = vst [vmem:[%s2143_s12 + $0xa8] sm:$0xff] %v1024_v37  ;;  %v998_v7 = vmul.f32 %v1452_v3, %v982_v40  ;;  %v967_v51 = vmul.f32 %v1454_v6, %v929_v22 }
 0x3c3   : > { %v1025_v49 = vmul.f32 %v2110_v12, %v998_v7  ;;  %v1026_v50 = vmul.f32 %v2112_v13, %v998_v7  ;;  %v983_v43 = vsub.f32 2.0, %v967_v51 }
 0x3c4   : > { %v1456_v44 = vpop.eup %1455 }
 0x3c5   : > { %1057 = vst [vmem:[%s2143_s12 + $0xb0] sm:$0xff] %v1025_v49  ;;  %1058 = vst [vmem:[%s2143_s12 + $0xb8] sm:$0xff] %v1026_v50  ;;  %v999_v9 = vmul.f32 %v1454_v6, %v983_v43  ;;  %v968_v10 = vmul.f32 %v1456_v44, %v932_v41 }
 0x3c7   : > { %v1027_v54 = vmul.f32 %v2116_v34, %v999_v9  ;;  %v1028_v47 = vmul.f32 %v2118_v35, %v999_v9  ;;  %v984_v60 = vsub.f32 2.0, %v968_v10 }
 0x3c8   : > { %v1458_v52 = vpop.eup %1457 }
 0x3c9   : > { %1059 = vst [vmem:[%s2143_s12 + $0xc0] sm:$0xff] %v1027_v54  ;;  %1060 = vst [vmem:[%s2143_s12 + $0xc8] sm:$0xff] %v1028_v47  ;;  %v1000_v12 = vmul.f32 %v1456_v44, %v984_v60  ;;  %v969_v53 = vmul.f32 %v1458_v52, %v935_v30 }
 0x3cb   : > { %v1029_v13 = vmul.f32 %v2122_v16, %v1000_v12  ;;  %v1030_v63 = vmul.f32 %v2124_v36, %v1000_v12  ;;  %v985_v2 = vsub.f32 2.0, %v969_v53 }
 0x3cc   : > { %v1460_v34 = vpop.eup %1459 }
 0x3cd   : > { %1061 = vst [vmem:[%s2143_s12 + $0xd0] sm:$0xff] %v1029_v13  ;;  %1062 = vst [vmem:[%s2143_s12 + $0xd8] sm:$0xff] %v1030_v63  ;;  %v1001_v35 = vmul.f32 %v1458_v52, %v985_v2  ;;  %v970_v5 = vmul.f32 %v1460_v34, %v938_v33 }
 0x3cf   : > { %v1031_v8 = vmul.f32 %v2128_v38, %v1001_v35  ;;  %v1032_v11 = vmul.f32 %v2130_v39, %v1001_v35  ;;  %v986_v55 = vsub.f32 2.0, %v970_v5 }
 0x3d1   : > { %1063 = vst [vmem:[%s2143_s12 + $0xe0] sm:$0xff] %v1031_v8  ;;  %1064 = vst [vmem:[%s2143_s12 + $0xe8] sm:$0xff] %v1032_v11  ;;  %v1002_v16 = vmul.f32 %v1460_v34, %v986_v55 }
 0x3d3   : > { %v1033_v36 = vmul.f32 %v2134_v45, %v1002_v16  ;;  %v1034_v38 = vmul.f32 %v2136_v48, %v1002_v16 }
 0x3d5   : > { %1065 = vst [vmem:[%s2143_s12 + $0xf0] sm:$0xff] %v1033_v36  ;;  %1066 = vst [vmem:[%s2143_s12 + $0xf8] sm:$0xff] %v1034_v38 }
 0x3d6   : > { %1530 = shalt.err (!%p1527_p5)
}
 0x3d7   : > { %s1531_s12 = scalar_lea.hbm %s2209_s13, 4096  ;;  %s1535_s19 = scalar_lea.hbm %s2316_s14, 16384 }
 0x3d8   : > { %p1532_p3 = scmp.ne.s32.totalorder %s2209_s13, %s1531_s12  ;;  %p1536_p0 = scmp.lt.s32.totalorder %s2209_s13, %s2316_s14 }
 0x3d9   : > { %p1537_p7 = scmp.lt.s32.totalorder %s1535_s19, %s1531_s12 }
 0x3da   : > { %p1533_p11 = pnand %p1532_p3, %p1774_p9 }
 0x3db   : > { %p1538_p10 = por %p1537_p7, %p1536_p0 }
 0x3dc   : > { %p1534_p13 = pneg %p1533_p11 }
 0x3de   : > { %p1539_p8 = pnand %p1538_p10, %p1534_p13 }
 0x3e0   : > { %1542 = shalt.err (!%p1539_p8)
}
 0x3e1   : > { %s1649_s28 = smov 256   ;;  %s1650_s6 = smov 16  }
 0x3e2   : > { %1255 = dma.vmem_to_hbm [thread:$0]  (%p1774_p9), %s2211_s21, 4096, %s2209_s13, %s1068_s5, %s1649_s28, %s1649_s28, %s1650_s6  }
 0x3e3 PF: > { %s2317_s24 = sld [smem:[#allocation11_spill]]  ;;  %p1269_p2 = scmp.ge.s32.totalorder %s1641_s7, 2 }
 0x3e4   : > { %p2318_p12 = scmp.ne.s32.totalorder %s2304_s20, 0 }
 0x3e6   : > { %p1265_p1 = pnand %p1269_p2, %p2318_p12 }
 0x3e8   : > { %p1266_p4 = pneg %p1265_p1 }
 0x3e9   : > { %s1099_s10 = sand.u32 1, %s2317_s24  }
 0x3ea   : > { %s1100_s12 = scalar_lea.sflag [#allocation4], %s1099_s10 }
 0x3eb   : > { %1596 = dma.done.wait (%p1266_p4), %s1100_s12, 4096  }
 0x3ec   : > { %1598 = vsyncadd (%p1266_p4), %s1100_s12, 4294963200  ;;  %s25_s7 = sadd.s32 1, %s1641_s7   ;;  %s2319_s9 = sld [smem:[#allocation14_spill]] }
 0x3ed   : > { %p22_p6 = scmp.ge.s32.totalorder %s25_s7, 6   ;;  %s2320_s13 = sld [smem:[#allocation15_spill]] }
 0x3ee   : > { %s2321_s21 = smov %s1605_s22  ;;  %s2322_s22 = smov %s1609_s23 }
 0x3ef   : > { %s2323_s23 = smov %s1824_s17  ;;  %s2324_s24 = smov %s1617_s25 }
 0x3f0   : > { %s2325_s25 = smov %s1621_s26  ;;  %s2326_s26 = smov %s1790_s8 }
 0x3f1   : > { %s2327_s27 = smov %s1633_s29  ;;  %s2328_s28 = smov %s1637_s30 }
 0x3f2   : > { %s2329_s29 = smov %s2319_s9  ;;  %24 = sbr.rel (!%p22_p6) target bundleno = 14 (0xe), region = 102 }
 0x3f3   : > { %s2330_s30 = smov %s2320_s13 }
 0x3f7   :  { %1105 = vsyncpa [#allocation3], 1 }
 0x3f8   :  { %1107 = vsyncpa [#allocation3 + $0x1], 1 }
 0x3f9   :  { %1108 = vsyncpa [#allocation6], 1 }
 0x3fa   :  { %1110 = vsyncpa [#allocation6 + $0x1], 1 }
 0x3fb   :  { %1111 = vsyncpa [#allocation4], 1 }
 0x3fc   :  { %1113 = vsyncpa [#allocation4 + $0x1], 1 }

</bundles_post_ra>
